<compile_context>
chip_gen: v7x
topology: tpu7x:2x2x1
jax: 0.10.0
libtpu: 0.0.40
codegen_flags: <defaults>
</compile_context>

<pallas_src>
import math

import jax
import jax.numpy as jnp
from jax.experimental import pallas as pl
from jax.experimental.pallas import tpu as pltpu

WINDOW = 7
PAD = WINDOW // 2
EPS = 1e-4  # num_stab_const in the torch module


# --------------------------- host-side constants ---------------------------
def _blockdiag_band(blk, reps):
    """(reps*blk, reps*blk) 0/1 block-diagonal band matrix.

    M[i, j] = 1 iff i and j fall in the same blk-sized block and |i - j| <= PAD
    inside it.  Multiplying by it performs the 7-wide, 'same'-zero-padded window
    sum along that axis for `reps` independent tiles stacked along the axis
    (no leakage across tile boundaries).
    """
    n = reps * blk
    idx = jnp.arange(n)
    same = (idx[:, None] // blk) == (idx[None, :] // blk)
    band = jnp.abs((idx[:, None] % blk) - (idx[None, :] % blk)) <= PAD
    return (same & band).astype(jnp.float32)


def _frame_selector(blk, reps):
    """(reps*blk, reps) 0/1 matrix: column f selects/sums tile slot f."""
    idx = jnp.arange(reps * blk)
    return ((idx[:, None] // blk) == jnp.arange(reps)[None, :]).astype(jnp.float32)


# --------------------------------- kernel ----------------------------------
def lncc_kernel(i_ref, j_ref, a_ref, b_ref, s_ref, t_ref, out_ref):
    bn, H, Wp = i_ref.shape
    F = s_ref.shape[1]              # frames packed along the lane axis
    W = Wp // F                     # true frame width
    BH = bn * H

    f32 = jnp.float32
    bf16 = jnp.bfloat16
    hi = jax.lax.Precision.HIGHEST
    inv_v = 1.0 / float(WINDOW * WINDOW)
    inv_hw = 1.0 / float(H * W)

    A = a_ref[...]                  # (BH, BH) bf16 block-diag row band
    B = b_ref[...]                  # (Wp, Wp) bf16 block-diag column band
    S = s_ref[...]                  # (Wp, F)  f32 frame-column selector
    T = t_ref[...]                  # (bn, BH) f32 row-block selector

    I = i_ref[...].reshape(BH, Wp)  # free relayout when H % 8 == 0
    J = j_ref[...].reshape(BH, Wp)

    # 5 window-sum operands, quantity-major along sublanes: (5*BH, Wp)
    X = jnp.concatenate([I, J, I * I, J * J, I * J], axis=0)

    # ---- column (lane-direction) window sums: 2 bf16 MXU passes (hi/lo) ----
    xh = X.astype(bf16)
    xl = (X - xh.astype(f32)).astype(bf16)
    CS = (jnp.dot(xh, B, preferred_element_type=f32)
          + jnp.dot(xl, B, preferred_element_type=f32))          # (5*BH, Wp) f32

    # ---- row (sublane-direction) window sums: 2 bf16 passes per quantity ----
    ch = CS.astype(bf16)
    cl = (CS - ch.astype(f32)).astype(bf16)

    def rowsum(q):
        s0 = q * BH
        return (jnp.dot(A, ch[s0:s0 + BH, :], preferred_element_type=f32)
                + jnp.dot(A, cl[s0:s0 + BH, :], preferred_element_type=f32))

    I_sum, J_sum, I2_sum, J2_sum, IJ_sum = [rowsum(q) for q in range(5)]

    # ---- per-pixel NCC map (lane-dense VPU work, rsqrt on the EUP) ----
    cross = jnp.maximum(IJ_sum - I_sum * J_sum * inv_v, EPS)
    I_var = jnp.maximum(I2_sum - I_sum * I_sum * inv_v, EPS)
    J_var = jnp.maximum(J2_sum - J_sum * J_sum * inv_v, EPS)
    ncc_map = cross * jax.lax.rsqrt(I_var * J_var)                # (BH, Wp)

    # ---- per-frame means via 0/1 selector matmuls (tiny, f32 HIGHEST) ----
    col = jnp.dot(ncc_map, S, preferred_element_type=f32, precision=hi)   # (BH, F)
    per_frame = jnp.dot(T, col, preferred_element_type=f32, precision=hi) * inv_hw
    out_ref[...] = per_frame.reshape(1, bn, F)


# -------------------------------- wrapper ----------------------------------
def lncc(I, J):
    """I, J: (N, 1, H, W). Returns (1 - ncc, ncc_per_frame) like the torch module."""
    N, C, H, W = I.shape
    assert C == 1 and J.shape == I.shape

    I2d = I[:, 0].astype(jnp.float32)
    J2d = J[:, 0].astype(jnp.float32)

    # ---- lane packing: fpack frames side by side along the lane axis ----
    if W >= 128:
        f0 = 1
    else:
        f0 = 128 // math.gcd(W, 128)          # smallest f with (f*W) % 128 == 0
        if f0 * W > 1024:                      # awkward W: give up on alignment
            f0 = 1
    # aim for ~256 lanes per packed row (keeps the block-diagonal band-matmul
    # waste small) but never pack far more rows than the batch needs.
    fpack = f0 * max(1, min(max(1, 256 // (f0 * W)), -(-N // f0)))
    Wp = fpack * W

    # ---- packed rows per grid step from an explicit VMEM budget ----
    slab = H * Wp * 4                          # one packed input row, f32
    bn = int(max(1, min(8, (4 << 20) // (4 * slab))))   # 2 inputs x 2 buffers
    n_rows_real = -(-N // fpack)
    bn = min(bn, max(1, -(-n_rows_real // 2)))  # keep >= 2 grid steps if possible
    n_steps = -(-n_rows_real // bn)
    if n_steps > 1 and n_steps % 2 == 1:        # even step count (v7x megacore)
        n_steps += 1
    n_rows = n_steps * bn
    n_frames = n_rows * fpack

    pad = n_frames - N
    if pad:                                     # zero frames -> ncc=1, sliced off
        z = jnp.zeros((pad, H, W), jnp.float32)
        I2d = jnp.concatenate([I2d, z], axis=0)
        J2d = jnp.concatenate([J2d, z], axis=0)

    def pack(x):                                # (n_frames,H,W) -> (n_rows,H,Wp)
        return (x.reshape(n_rows, fpack, H, W)
                 .transpose(0, 2, 1, 3)
                 .reshape(n_rows, H, Wp))
    Ip, Jp = pack(I2d), pack(J2d)

    A = _blockdiag_band(H, bn).astype(jnp.bfloat16)      # (bn*H, bn*H), 0/1 exact
    B = _blockdiag_band(W, fpack).astype(jnp.bfloat16)   # (Wp, Wp)
    S = _frame_selector(W, fpack)                        # (Wp, fpack) f32
    T = _frame_selector(H, bn).T                         # (bn, bn*H) f32

    nccpf = pl.pallas_call(
        lncc_kernel,
        out_shape=jax.ShapeDtypeStruct((n_steps, bn, fpack), jnp.float32),
        grid_spec=pltpu.PrefetchScalarGridSpec(
            num_scalar_prefetch=0,
            grid=(n_steps,),
            in_specs=[
                pl.BlockSpec((bn, H, Wp), lambda n: (n, 0, 0)),
                pl.BlockSpec((bn, H, Wp), lambda n: (n, 0, 0)),
                pl.BlockSpec((bn * H, bn * H), lambda n: (0, 0)),
                pl.BlockSpec((Wp, Wp), lambda n: (0, 0)),
                pl.BlockSpec((Wp, fpack), lambda n: (0, 0)),
                pl.BlockSpec((bn, bn * H), lambda n: (0, 0)),
            ],
            out_specs=pl.BlockSpec((1, bn, fpack), lambda n: (n, 0, 0)),
        ),
        compiler_params=pltpu.CompilerParams(
            dimension_semantics=("parallel",),
            vmem_limit_bytes=40 << 20),
    )(Ip, Jp, A, B, S, T)

    ncc_per_frame = nccpf.reshape(-1)[:N]                 # (N,)
    weight = jnp.full((N,), 1.0 / N, jnp.float32)         # torch: 1/I.shape[0] each
    ncc = jnp.sum(ncc_per_frame * weight)
    return 1.0 - ncc, ncc_per_frame


# ---- pure-JAX reference (mirrors the torch forward with F.conv2d) ----
def lncc_ref(I, J):
    N = I.shape[0]
    kern = jnp.ones((1, 1, WINDOW, WINDOW), jnp.float32)
    conv = lambda x: jax.lax.conv_general_dilated(
        x.astype(jnp.float32), kern, (1, 1), [(PAD, PAD), (PAD, PAD)],
        dimension_numbers=("NCHW", "OIHW", "NCHW"),
        precision=jax.lax.Precision.HIGHEST)
    I_sum, J_sum = conv(I), conv(J)
    I2_sum, J2_sum, IJ_sum = conv(I * I), conv(J * J), conv(I * J)
    V = float(WINDOW ** 2)
    cross = jnp.maximum(IJ_sum - I_sum * J_sum / V, EPS)
    I_var = jnp.maximum(I2_sum - I_sum ** 2 / V, EPS)
    J_var = jnp.maximum(J2_sum - J_sum ** 2 / V, EPS)
    ncc_map = cross / jnp.sqrt(I_var * J_var)
    ncc_per_frame = ncc_map.mean(axis=(1, 2, 3))
    ncc = jnp.sum(ncc_per_frame * (1.0 / N))
    return 1.0 - ncc, ncc_per_frame


if __name__ == "__main__":
    key = jax.random.PRNGKey(0)

    # (a) tiny batch, single packed row; (b) W=24 lane-packing + zero-frame pad;
    # (c) larger batch exercising bn > 1, multiple (even) grid steps and padding.
    for (N, H, W) in [(2, 16, 16), (5, 24, 24), (40, 16, 16)]:
        key, k1, k2 = jax.random.split(key, 3)
        I = jax.random.uniform(k1, (N, 1, H, W), jnp.float32)
        J = jax.random.uniform(k2, (N, 1, H, W), jnp.float32)

        loss, ncc_per_frame = lncc(I, J)
        jax.block_until_ready((loss, ncc_per_frame))

        loss_ref, nccpf_ref = lncc_ref(I, J)
        assert jnp.allclose(loss, loss_ref, atol=1e-4, rtol=1e-4), (
            N, H, W, float(loss), float(loss_ref))
        assert jnp.allclose(ncc_per_frame, nccpf_ref, atol=1e-4, rtol=1e-4), (N, H, W)

    print("KERNEL_OK")
</pallas_src>

<mosaic_0001>
module attributes {stable_mosaic.version = 11 : i64} {
  func.func @lncc_kernel(%arg0: i32, %arg1: memref<1x16x128xf32, #tpu.memory_space<vmem>>, %arg2: memref<1x16x128xf32, #tpu.memory_space<vmem>>, %arg3: memref<16x16xbf16, #tpu.memory_space<vmem>>, %arg4: memref<128x128xbf16, #tpu.memory_space<vmem>>, %arg5: memref<128x8xf32, #tpu.memory_space<vmem>>, %arg6: memref<1x16xf32, #tpu.memory_space<vmem>>, %arg7: memref<1x1x8xf32, #tpu.memory_space<vmem>>) attributes {dimension_semantics = [#tpu.dimension_semantics<parallel>], iteration_bounds = array<i64: 1>, scalar_prefetch = 0 : i64, scratch_operands = 0 : i64, tpu.core_type = #tpu.core_type<tc>, window_params = [{transform_indices = @transform_0, window_bounds = array<i64: 1, 16, 128>}, {transform_indices = @transform_1, window_bounds = array<i64: 1, 16, 128>}, {pipeline_mode = #tpu.pipeline_mode<synchronous>, transform_indices = @transform_2, window_bounds = array<i64: 16, 16>}, {pipeline_mode = #tpu.pipeline_mode<synchronous>, transform_indices = @transform_3, window_bounds = array<i64: 128, 128>}, {pipeline_mode = #tpu.pipeline_mode<synchronous>, transform_indices = @transform_4, window_bounds = array<i64: 128, 8>}, {pipeline_mode = #tpu.pipeline_mode<synchronous>, transform_indices = @transform_5, window_bounds = array<i64: 1, 16>}, {transform_indices = @transform_6, window_bounds = array<i64: 1, 1, 8>}]} {
    %c0 = arith.constant 0 : index
    %c0_0 = arith.constant 0 : index
    %0 = vector.load %arg3[%c0, %c0_0] : memref<16x16xbf16, #tpu.memory_space<vmem>>, vector<16x16xbf16>
    %c0_1 = arith.constant 0 : index
    %c0_2 = arith.constant 0 : index
    %1 = vector.load %arg4[%c0_1, %c0_2] : memref<128x128xbf16, #tpu.memory_space<vmem>>, vector<128x128xbf16>
    %c0_3 = arith.constant 0 : index
    %c0_4 = arith.constant 0 : index
    %2 = vector.load %arg5[%c0_3, %c0_4] : memref<128x8xf32, #tpu.memory_space<vmem>>, vector<128x8xf32>
    %c0_5 = arith.constant 0 : index
    %c0_6 = arith.constant 0 : index
    %3 = vector.load %arg6[%c0_5, %c0_6] : memref<1x16xf32, #tpu.memory_space<vmem>>, vector<1x16xf32>
    %c0_7 = arith.constant 0 : index
    %c0_8 = arith.constant 0 : index
    %c0_9 = arith.constant 0 : index
    %4 = vector.load %arg1[%c0_7, %c0_8, %c0_9] : memref<1x16x128xf32, #tpu.memory_space<vmem>>, vector<1x16x128xf32>
    %5 = vector.shape_cast %4 : vector<1x16x128xf32> to vector<16x128xf32>
    %c0_10 = arith.constant 0 : index
    %c0_11 = arith.constant 0 : index
    %c0_12 = arith.constant 0 : index
    %6 = vector.load %arg2[%c0_10, %c0_11, %c0_12] : memref<1x16x128xf32, #tpu.memory_space<vmem>>, vector<1x16x128xf32>
    %7 = vector.shape_cast %6 : vector<1x16x128xf32> to vector<16x128xf32>
    %8 = arith.mulf %5, %5 : vector<16x128xf32>
    %9 = arith.mulf %7, %7 : vector<16x128xf32>
    %10 = arith.mulf %5, %7 : vector<16x128xf32>
    %11 = tpu.concatenate %5, %7, %8, %9, %10 in 0 : vector<16x128xf32>, vector<16x128xf32>, vector<16x128xf32>, vector<16x128xf32>, vector<16x128xf32> -> vector<80x128xf32>
    %12 = arith.truncf %11 : vector<80x128xf32> to vector<80x128xbf16>
    %13 = arith.extf %12 : vector<80x128xbf16> to vector<80x128xf32>
    %14 = arith.subf %11, %13 : vector<80x128xf32>
    %15 = arith.truncf %14 : vector<80x128xf32> to vector<80x128xbf16>
    %cst = arith.constant dense<0.000000e+00> : vector<80x128xf32>
    %16 = tpu.matmul %12, %1, %cst {dimension_numbers = #tpu.dot_dimension_numbers<[1], [0], [0], [1], [0, 0, 1, 1], [], []>} : vector<80x128xbf16>, vector<128x128xbf16>, vector<80x128xf32> -> vector<80x128xf32>
    %cst_13 = arith.constant dense<0.000000e+00> : vector<80x128xf32>
    %17 = tpu.matmul %15, %1, %cst_13 {dimension_numbers = #tpu.dot_dimension_numbers<[1], [0], [0], [1], [0, 0, 1, 1], [], []>} : vector<80x128xbf16>, vector<128x128xbf16>, vector<80x128xf32> -> vector<80x128xf32>
    %18 = arith.addf %16, %17 : vector<80x128xf32>
    %19 = arith.truncf %18 : vector<80x128xf32> to vector<80x128xbf16>
    %20 = arith.extf %19 : vector<80x128xbf16> to vector<80x128xf32>
    %21 = arith.subf %18, %20 : vector<80x128xf32>
    %22 = arith.truncf %21 : vector<80x128xf32> to vector<80x128xbf16>
    %23 = vector.extract_strided_slice %19 {offsets = [0, 0], sizes = [16, 128], strides = [1, 1]} : vector<80x128xbf16> to vector<16x128xbf16>
    %cst_14 = arith.constant dense<0.000000e+00> : vector<16x128xf32>
    %24 = tpu.matmul %0, %23, %cst_14 {dimension_numbers = #tpu.dot_dimension_numbers<[1], [0], [0], [1], [0, 0, 1, 1], [], []>} : vector<16x16xbf16>, vector<16x128xbf16>, vector<16x128xf32> -> vector<16x128xf32>
    %25 = vector.extract_strided_slice %22 {offsets = [0, 0], sizes = [16, 128], strides = [1, 1]} : vector<80x128xbf16> to vector<16x128xbf16>
    %cst_15 = arith.constant dense<0.000000e+00> : vector<16x128xf32>
    %26 = tpu.matmul %0, %25, %cst_15 {dimension_numbers = #tpu.dot_dimension_numbers<[1], [0], [0], [1], [0, 0, 1, 1], [], []>} : vector<16x16xbf16>, vector<16x128xbf16>, vector<16x128xf32> -> vector<16x128xf32>
    %27 = arith.addf %24, %26 : vector<16x128xf32>
    %28 = vector.extract_strided_slice %19 {offsets = [16, 0], sizes = [16, 128], strides = [1, 1]} : vector<80x128xbf16> to vector<16x128xbf16>
    %cst_16 = arith.constant dense<0.000000e+00> : vector<16x128xf32>
    %29 = tpu.matmul %0, %28, %cst_16 {dimension_numbers = #tpu.dot_dimension_numbers<[1], [0], [0], [1], [0, 0, 1, 1], [], []>} : vector<16x16xbf16>, vector<16x128xbf16>, vector<16x128xf32> -> vector<16x128xf32>
    %30 = vector.extract_strided_slice %22 {offsets = [16, 0], sizes = [16, 128], strides = [1, 1]} : vector<80x128xbf16> to vector<16x128xbf16>
    %cst_17 = arith.constant dense<0.000000e+00> : vector<16x128xf32>
    %31 = tpu.matmul %0, %30, %cst_17 {dimension_numbers = #tpu.dot_dimension_numbers<[1], [0], [0], [1], [0, 0, 1, 1], [], []>} : vector<16x16xbf16>, vector<16x128xbf16>, vector<16x128xf32> -> vector<16x128xf32>
    %32 = arith.addf %29, %31 : vector<16x128xf32>
    %33 = vector.extract_strided_slice %19 {offsets = [32, 0], sizes = [16, 128], strides = [1, 1]} : vector<80x128xbf16> to vector<16x128xbf16>
    %cst_18 = arith.constant dense<0.000000e+00> : vector<16x128xf32>
    %34 = tpu.matmul %0, %33, %cst_18 {dimension_numbers = #tpu.dot_dimension_numbers<[1], [0], [0], [1], [0, 0, 1, 1], [], []>} : vector<16x16xbf16>, vector<16x128xbf16>, vector<16x128xf32> -> vector<16x128xf32>
    %35 = vector.extract_strided_slice %22 {offsets = [32, 0], sizes = [16, 128], strides = [1, 1]} : vector<80x128xbf16> to vector<16x128xbf16>
    %cst_19 = arith.constant dense<0.000000e+00> : vector<16x128xf32>
    %36 = tpu.matmul %0, %35, %cst_19 {dimension_numbers = #tpu.dot_dimension_numbers<[1], [0], [0], [1], [0, 0, 1, 1], [], []>} : vector<16x16xbf16>, vector<16x128xbf16>, vector<16x128xf32> -> vector<16x128xf32>
    %37 = arith.addf %34, %36 : vector<16x128xf32>
    %38 = vector.extract_strided_slice %19 {offsets = [48, 0], sizes = [16, 128], strides = [1, 1]} : vector<80x128xbf16> to vector<16x128xbf16>
    %cst_20 = arith.constant dense<0.000000e+00> : vector<16x128xf32>
    %39 = tpu.matmul %0, %38, %cst_20 {dimension_numbers = #tpu.dot_dimension_numbers<[1], [0], [0], [1], [0, 0, 1, 1], [], []>} : vector<16x16xbf16>, vector<16x128xbf16>, vector<16x128xf32> -> vector<16x128xf32>
    %40 = vector.extract_strided_slice %22 {offsets = [48, 0], sizes = [16, 128], strides = [1, 1]} : vector<80x128xbf16> to vector<16x128xbf16>
    %cst_21 = arith.constant dense<0.000000e+00> : vector<16x128xf32>
    %41 = tpu.matmul %0, %40, %cst_21 {dimension_numbers = #tpu.dot_dimension_numbers<[1], [0], [0], [1], [0, 0, 1, 1], [], []>} : vector<16x16xbf16>, vector<16x128xbf16>, vector<16x128xf32> -> vector<16x128xf32>
    %42 = arith.addf %39, %41 : vector<16x128xf32>
    %43 = vector.extract_strided_slice %19 {offsets = [64, 0], sizes = [16, 128], strides = [1, 1]} : vector<80x128xbf16> to vector<16x128xbf16>
    %cst_22 = arith.constant dense<0.000000e+00> : vector<16x128xf32>
    %44 = tpu.matmul %0, %43, %cst_22 {dimension_numbers = #tpu.dot_dimension_numbers<[1], [0], [0], [1], [0, 0, 1, 1], [], []>} : vector<16x16xbf16>, vector<16x128xbf16>, vector<16x128xf32> -> vector<16x128xf32>
    %45 = vector.extract_strided_slice %22 {offsets = [64, 0], sizes = [16, 128], strides = [1, 1]} : vector<80x128xbf16> to vector<16x128xbf16>
    %cst_23 = arith.constant dense<0.000000e+00> : vector<16x128xf32>
    %46 = tpu.matmul %0, %45, %cst_23 {dimension_numbers = #tpu.dot_dimension_numbers<[1], [0], [0], [1], [0, 0, 1, 1], [], []>} : vector<16x16xbf16>, vector<16x128xbf16>, vector<16x128xf32> -> vector<16x128xf32>
    %47 = arith.addf %44, %46 : vector<16x128xf32>
    %48 = arith.mulf %27, %32 : vector<16x128xf32>
    %cst_24 = arith.constant 0.0204081628 : f32
    %49 = vector.broadcast %cst_24 : f32 to vector<16x128xf32>
    %50 = arith.mulf %48, %49 : vector<16x128xf32>
    %51 = arith.subf %47, %50 : vector<16x128xf32>
    %cst_25 = arith.constant 9.99999974E-5 : f32
    %52 = vector.broadcast %cst_25 : f32 to vector<16x128xf32>
    %53 = arith.maximumf %51, %52 : vector<16x128xf32>
    %54 = arith.mulf %27, %27 : vector<16x128xf32>
    %cst_26 = arith.constant 0.0204081628 : f32
    %55 = vector.broadcast %cst_26 : f32 to vector<16x128xf32>
    %56 = arith.mulf %54, %55 : vector<16x128xf32>
    %57 = arith.subf %37, %56 : vector<16x128xf32>
    %cst_27 = arith.constant 9.99999974E-5 : f32
    %58 = vector.broadcast %cst_27 : f32 to vector<16x128xf32>
    %59 = arith.maximumf %57, %58 : vector<16x128xf32>
    %60 = arith.mulf %32, %32 : vector<16x128xf32>
    %cst_28 = arith.constant 0.0204081628 : f32
    %61 = vector.broadcast %cst_28 : f32 to vector<16x128xf32>
    %62 = arith.mulf %60, %61 : vector<16x128xf32>
    %63 = arith.subf %42, %62 : vector<16x128xf32>
    %cst_29 = arith.constant 9.99999974E-5 : f32
    %64 = vector.broadcast %cst_29 : f32 to vector<16x128xf32>
    %65 = arith.maximumf %63, %64 : vector<16x128xf32>
    %66 = arith.mulf %59, %65 : vector<16x128xf32>
    %67 = math.rsqrt %66 : vector<16x128xf32>
    %68 = arith.mulf %53, %67 : vector<16x128xf32>
    %cst_30 = arith.constant dense<0.000000e+00> : vector<16x8xf32>
    %69 = tpu.matmul %68, %2, %cst_30 {dimension_numbers = #tpu.dot_dimension_numbers<[1], [0], [0], [1], [0, 0, 1, 1], [], []>, precision = #tpu.contract_precision<fp32>} : vector<16x128xf32>, vector<128x8xf32>, vector<16x8xf32> -> vector<16x8xf32>
    %cst_31 = arith.constant dense<0.000000e+00> : vector<1x8xf32>
    %70 = tpu.matmul %3, %69, %cst_31 {dimension_numbers = #tpu.dot_dimension_numbers<[1], [0], [0], [1], [0, 0, 1, 1], [], []>, precision = #tpu.contract_precision<fp32>} : vector<1x16xf32>, vector<16x8xf32>, vector<1x8xf32> -> vector<1x8xf32>
    %cst_32 = arith.constant 3.906250e-03 : f32
    %71 = vector.broadcast %cst_32 : f32 to vector<1x8xf32>
    %72 = arith.mulf %70, %71 : vector<1x8xf32>
    %73 = vector.shape_cast %72 : vector<1x8xf32> to vector<1x1x8xf32>
    %c0_33 = arith.constant 0 : index
    %c0_34 = arith.constant 0 : index
    %c0_35 = arith.constant 0 : index
    %74 = vector.load %arg7[%c0_33, %c0_34, %c0_35] : memref<1x1x8xf32, #tpu.memory_space<vmem>>, vector<1x1x8xf32>
    tpu.vector_store %arg7[%c0_33, %c0_34, %c0_35], %73 {strides = array<i32>} : memref<1x1x8xf32, #tpu.memory_space<vmem>>, vector<1x1x8xf32>,
    return
  }
  func.func @transform_0(%arg0: i32) -> (i32, i32, i32) {
    %c0_i32 = arith.constant 0 : i32
    %c0_i32_0 = arith.constant 0 : i32
    %c0_i32_1 = arith.constant 0 : i32
    return %arg0, %c0_i32, %c0_i32_0 : i32, i32, i32
  }
  func.func @transform_1(%arg0: i32) -> (i32, i32, i32) {
    %c0_i32 = arith.constant 0 : i32
    %c0_i32_0 = arith.constant 0 : i32
    %c0_i32_1 = arith.constant 0 : i32
    return %arg0, %c0_i32, %c0_i32_0 : i32, i32, i32
  }
  func.func @transform_2(%arg0: i32) -> (i32, i32) {
    %c0_i32 = arith.constant 0 : i32
    %c0_i32_0 = arith.constant 0 : i32
    %c0_i32_1 = arith.constant 0 : i32
    return %c0_i32, %c0_i32_0 : i32, i32
  }
  func.func @transform_3(%arg0: i32) -> (i32, i32) {
    %c0_i32 = arith.constant 0 : i32
    %c0_i32_0 = arith.constant 0 : i32
    %c0_i32_1 = arith.constant 0 : i32
    return %c0_i32, %c0_i32_0 : i32, i32
  }
  func.func @transform_4(%arg0: i32) -> (i32, i32) {
    %c0_i32 = arith.constant 0 : i32
    %c0_i32_0 = arith.constant 0 : i32
    %c0_i32_1 = arith.constant 0 : i32
    return %c0_i32, %c0_i32_0 : i32, i32
  }
  func.func @transform_5(%arg0: i32) -> (i32, i32) {
    %c0_i32 = arith.constant 0 : i32
    %c0_i32_0 = arith.constant 0 : i32
    %c0_i32_1 = arith.constant 0 : i32
    return %c0_i32, %c0_i32_0 : i32, i32
  }
  func.func @transform_6(%arg0: i32) -> (i32, i32, i32) {
    %c0_i32 = arith.constant 0 : i32
    %c0_i32_0 = arith.constant 0 : i32
    %c0_i32_1 = arith.constant 0 : i32
    return %arg0, %c0_i32, %c0_i32_0 : i32, i32, i32
  }
}

</mosaic_0001>

<bundles_post_ra>
// kernel: tpu_custom_call.1
= control target key start
LH: loop header
LB: loop body
LE: loop exit
PB: predicated region body
PF: predicated region fallthrough
CT: control target
= control target key end

     0   :  { %v2820_v1 = vmov 0.0   ;;  %vm2821_vm0 = vmmov 0   ;;  %s3292_s0 = inlined_call_operand.vmem [shape: f32[1,16,128], index: 0, kind: input, shape index: {}]   ;;  %s3293_s1 = inlined_call_operand.vmem [shape: f32[1,16,128], index: 1, kind: input, shape index: {}]   ;;  %s3294_s2 = inlined_call_operand.vmem [shape: bf16[16,16], index: 2, kind: input, shape index: {}]   ;;  %s3295_s3 = inlined_call_operand.vmem [shape: bf16[128,128], index: 3, kind: input, shape index: {}]   ;;  %s3296_s4 = inlined_call_operand.vmem [shape: f32[128,8], index: 4, kind: input, shape index: {}]   ;;  %s3297_s5 = inlined_call_operand.vmem [shape: f32[1,16], index: 5, kind: input, shape index: {}]   ;;  %s3298_s6 = inlined_call_operand.hbm [shape: f32[1,1,8], index: 6, kind: output, shape index: {}]  }
   0x1   :  { %v2783_v0 = vld [vmem:[%s3295_s3] sm:$0xff]   ;;  %2127 = vmatprep.subr.bf16.mxu0 %v2820_v1  ;;  %2205 = vmatprep.subr.bf16.mxu1 %v2820_v1  ;;  %v2784_v2 = vld [vmem:[%s3295_s3 + $0x8] sm:$0xff]   ;;  %v2785_v3 = vld [vmem:[%s3295_s3 + $0x10] sm:$0xff]  }
   0x2   :  { %2128 = vmatpush3.bf16.msra.mxu0 %v2783_v0  ;;  %2143 = vmatprep.mubr.msk.bf16.mxu0 %vm2821_vm0, %v2820_v1  ;;  %v2786_v4 = vld [vmem:[%s3295_s3 + $0x18] sm:$0xff]  }
   0x3   :  { %2129 = vmatprep.subr.bf16.mxu0 %v2820_v1  ;;  %2207 = vmatprep.mubr.msk.bf16.mxu1 %vm2821_vm0, %v2820_v1 }
   0x6   :  { %2130 = vmatpush3.bf16.msra.mxu0 %v2784_v2 }
   0x7   :  { %2131 = vmatprep.subr.bf16.mxu0 %v2820_v1 }
   0xa   :  { %2132 = vmatpush3.bf16.msra.mxu0 %v2785_v3 }
   0xb   :  { %11 = vsyncpa [#allocation3], 0  ;;  %2133 = vmatprep.subr.bf16.mxu0 %v2820_v1  ;;  %v2787_v5 = vld [vmem:[%s3295_s3 + $0x20] sm:$0xff]   ;;  %v61_v7 = vld [vmem:[%s3292_s0 + $0x8] sm:$0xff]  ;;  %vm329_vm1 = vcmask 130048   ;;  %vm1920_vm2 = vcmask 57344  }
   0xc   :  { %v60_v6 = vld [vmem:[%s3292_s0] sm:$0xff]  ;;  %v2788_v9 = vld [vmem:[%s3295_s3 + $0x28] sm:$0xff]   ;;  %v2789_v12 = vld [vmem:[%s3295_s3 + $0x30] sm:$0xff]   ;;  %v65_v23 = vmul.f32 %v61_v7, %v61_v7 }
   0xd   :  { %v2890_v8 = vpack.c.bf16 %v61_v7, %v60_v6  ;;  %v62_v13 = vld [vmem:[%s3293_s1] sm:$0xff]  ;;  %v63_v14 = vld [vmem:[%s3293_s1 + $0x8] sm:$0xff]  ;;  %v2790_v18 = vld [vmem:[%s3295_s3 + $0x38] sm:$0xff]   ;;  %v64_v19 = vmul.f32 %v60_v6, %v60_v6 }
   0xe   :  { %2134 = vmatpush3.bf16.msra.mxu0 %v2786_v4  ;;  %v2908_v17 = vpack.c.bf16 %v63_v14, %v62_v13  ;;  %v66_v27 = vmul.f32 %v62_v13, %v62_v13  ;;  %v67_v31 = vmul.f32 %v63_v14, %v63_v14  ;;  %v68_v35 = vmul.f32 %v62_v13, %v60_v6  ;;  %v2950_v54 = vld [vmem:[%s3294_s2] sm:$0xff]  }
   0xf   :  { %2135 = vmatprep.subr.bf16.mxu0 %v2820_v1  ;;  %v75_v10 = vunpack.c.l.bf16 %v2890_v8  ;;  %v76_v11 = vunpack.c.h.bf16 %v2890_v8  ;;  %v72_v26 = vpack.c.bf16 %v65_v23, %v64_v19  ;;  %v69_v39 = vmul.f32 %v63_v14, %v61_v7 }
  0x10   :  { %v77_v21 = vunpack.c.l.bf16 %v2908_v17  ;;  %v78_v22 = vunpack.c.h.bf16 %v2908_v17  ;;  %v73_v34 = vpack.c.bf16 %v67_v31, %v66_v27 }
  0x11   :  { %v85_v15 = vsub.f32 %v60_v6, %v75_v10  ;;  %v86_v16 = vsub.f32 %v61_v7, %v76_v11  ;;  %v79_v29 = vunpack.c.l.bf16 %v72_v26  ;;  %v80_v30 = vunpack.c.h.bf16 %v72_v26 }
  0x12   :  { %2136 = vmatpush3.bf16.msra.mxu0 %v2787_v5  ;;  %v87_v24 = vsub.f32 %v62_v13, %v77_v21  ;;  %v88_v25 = vsub.f32 %v63_v14, %v78_v22  ;;  %v81_v37 = vunpack.c.l.bf16 %v73_v34  ;;  %v82_v38 = vunpack.c.h.bf16 %v73_v34 }
  0x13   :  { %2137 = vmatprep.subr.bf16.mxu0 %v2820_v1  ;;  %v95_v20 = vpack.c.bf16 %v86_v16, %v85_v15  ;;  %v89_v32 = vsub.f32 %v64_v19, %v79_v29  ;;  %v90_v33 = vsub.f32 %v65_v23, %v80_v30  ;;  %v74_v42 = vpack.c.bf16 %v69_v39, %v68_v35 }
  0x14   :  { %v96_v28 = vpack.c.bf16 %v88_v25, %v87_v24  ;;  %v91_v40 = vsub.f32 %v66_v27, %v81_v37  ;;  %v92_v41 = vsub.f32 %v67_v31, %v82_v38  ;;  %v43_v37 = vld [vmem:[%s3296_s4] sm:$0xff]  ;;  %v44_v38 = vld [vmem:[%s3296_s4 + $0x8] sm:$0xff] }
  0x15   :  { %v97_v36 = vpack.c.bf16 %v90_v33, %v89_v32  ;;  %v83_v44 = vunpack.c.l.bf16 %v74_v42  ;;  %v84_v45 = vunpack.c.h.bf16 %v74_v42 }
  0x16   :  { %2138 = vmatpush3.bf16.msra.mxu0 %v2788_v9  ;;  %v98_v43 = vpack.c.bf16 %v92_v41, %v91_v40  ;;  %v777_v40 = vand.u32 4294901760, %v44_v38 }
  0x17   :  { %2139 = vmatprep.subr.bf16.mxu0 %v2820_v1  ;;  %v93_v46 = vsub.f32 %v68_v35, %v83_v44  ;;  %v94_v47 = vsub.f32 %v69_v39, %v84_v45  ;;  %v774_v39 = vand.u32 4294901760, %v43_v37  ;;  %v46_v44 = vld [vmem:[%s3296_s4 + $0x18] sm:$0xff] }
  0x19   :  { %v99_v48 = vpack.c.bf16 %v94_v47, %v93_v46  ;;  %v3002_v41 = vsub.f32 %v43_v37, %v774_v39  ;;  %v783_v47 = vand.u32 4294901760, %v46_v44 }
  0x1a   :  { %2140 = vmatpush3.bf16.msra.mxu0 %v2789_v12 }
  0x1b   :  { %2141 = vmatprep.subr.bf16.mxu0 %v2820_v1  ;;  %v877_v37 = vand.u32 4294901760, %v3002_v41 }
  0x1e   :  { %2142 = vmatpush3.bf16.msra.mxu0 %v2790_v18 }
  0x1f   :  { %2163 = vmatprep.subr.bf16.mxu0 %v2820_v1 }
  0x21   :  { %2144 = vmatmul.mubr.bf16.vlgmr.msra.gmra.mrb[0].mxu0 %v95_v20 }
  0x22   :  { %2164 = vmatpush3.bf16.msra.mxu0 %v2783_v0  ;;  %2147 = vmatprep.mubr.msk.bf16.mxu0 %vm2821_vm0, %v2820_v1 }
  0x23   :  { %2165 = vmatprep.subr.bf16.mxu0 %v2820_v1 }
  0x26   :  { %2166 = vmatpush3.bf16.msra.mxu0 %v2784_v2 }
  0x27   :  { %2167 = vmatprep.subr.bf16.mxu0 %v2820_v1 }
  0x29   :  { %2148 = vmatmul.mubr.bf16.gmra.mrb[4].mxu0 %v96_v28 }
  0x2a   :  { %2151 = vmatprep.mubr.msk.bf16.mxu0 %vm2821_vm0, %v2820_v1  ;;  %2168 = vmatpush3.bf16.msra.mxu0 %v2785_v3 }
  0x2b   :  { %2169 = vmatprep.subr.bf16.mxu0 %v2820_v1 }
  0x2e   :  { %2170 = vmatpush3.bf16.msra.mxu0 %v2786_v4 }
  0x2f   :  { %2171 = vmatprep.subr.bf16.mxu0 %v2820_v1 }
  0x31   :  { %2152 = vmatmul.mubr.bf16.gmra.mrb[8].mxu0 %v97_v36 }
  0x32   :  { %2155 = vmatprep.mubr.msk.bf16.mxu0 %vm2821_vm0, %v2820_v1  ;;  %2172 = vmatpush3.bf16.msra.mxu0 %v2787_v5 }
  0x33   :  { %2173 = vmatprep.subr.bf16.mxu0 %v2820_v1 }
  0x36   :  { %2174 = vmatpush3.bf16.msra.mxu0 %v2788_v9 }
  0x37   :  { %2175 = vmatprep.subr.bf16.mxu0 %v2820_v1 }
  0x39   :  { %2156 = vmatmul.mubr.bf16.gmra.mrb[12].mxu0 %v98_v43  ;;  %v45_v43 = vld [vmem:[%s3296_s4 + $0x10] sm:$0xff] }
  0x3a   :  { %2159 = vmatprep.mubr.msk.bf16.mxu0 %vm2821_vm0, %v2820_v1  ;;  %2176 = vmatpush3.bf16.msra.mxu0 %v2789_v12  ;;  %v780_v46 = vand.u32 4294901760, %v45_v43 }
  0x3b   :  { %2177 = vmatprep.subr.bf16.mxu0 %v2820_v1 }
  0x3e   :  { %2178 = vmatpush3.bf16.msra.mxu0 %v2790_v18 }
  0x3f   :  { %2199 = vmatprep.subr.bf16.mxu0 %v2820_v1 }
  0x41   :  { %2160 = vmatmul.mubr.bf16.gmra.mrb[16].mxu0 %v99_v48  ;;  %v3014_v48 = vsub.f32 %v45_v43, %v780_v46 }
  0x42   :  { %2179 = vmatprep.mubr.msk.bf16.mxu0 %vm2821_vm0, %v2820_v1 }
  0x49   :  { %2180 = vmatmul.mubr.bf16.vlgmr.msra.gmra.mrb[0].mxu0 %v2890_v8 }
  0x4a   :  { %2183 = vmatprep.mubr.msk.bf16.mxu0 %vm2821_vm0, %v2820_v1 }
  0x51   :  { %2184 = vmatmul.mubr.bf16.gmra.mrb[4].mxu0 %v2908_v17 }
  0x52   :  { %2187 = vmatprep.mubr.msk.bf16.mxu0 %vm2821_vm0, %v2820_v1 }
  0x59   :  { %2188 = vmatmul.mubr.bf16.gmra.mrb[8].mxu0 %v72_v26 }
  0x5a   :  { %2191 = vmatprep.mubr.msk.bf16.mxu0 %vm2821_vm0, %v2820_v1 }
  0x61   :  { %2192 = vmatmul.mubr.bf16.gmra.mrb[12].mxu0 %v73_v34 }
  0x62   :  { %2195 = vmatprep.mubr.msk.bf16.mxu0 %vm2821_vm0, %v2820_v1 }
  0x69   :  { %2196 = vmatmul.mubr.bf16.gmra.mrb[16].mxu0 %v74_v42  ;;  %v3004_v42 = vsub.f32 %v44_v38, %v777_v40 }
  0x6a   :  { %2201 = vmatprep.mubr.msk.bf16.mxu0 %vm2821_vm0, %v2820_v1 }
  0x6b   :  { %v2575_v45 = vpack.c.bf16 %v3004_v42, %v3002_v41  ;;  %v884_v38 = vand.u32 4294901760, %v3004_v42 }
  0x6d   :  { %v885_v43 = vsub.f32 %v3004_v42, %v884_v38 }
 0x11c   :  { %v255_v49 = vpop.f32.mrb[0].mxu0 }
 0x11d   :  { %v2181_v50 = vpop.f32.mrb[1].mxu0 }
 0x11e   :  { %v258_v51 = vpop.f32.mrb[2].mxu0  ;;  %v47_v50 = vld [vmem:[%s3296_s4 + $0x20] sm:$0xff] }
 0x11f   :  { %v294_v52 = vpack.c.bf16 %v258_v51, %v255_v49  ;;  %v2182_v53 = vpop.f32.mrb[3].mxu0 }
 0x120   :  { %v786_v53 = vand.u32 4294901760, %v47_v50 }
 0x121   :  { %v299_v55 = vunpack.c.l.bf16 %v294_v52  ;;  %v300_v56 = vunpack.c.h.bf16 %v294_v52  ;;  %2206 = vmatpush3.bf16.msra.mxu1 %v294_v52 }
 0x122   :  { %2211 = vmatprep.subr.bf16.mxu1 %v2820_v1 }
 0x123   :  { %v309_v57 = vsub.f32 %v255_v49, %v299_v55  ;;  %v310_v58 = vsub.f32 %v258_v51, %v300_v56  ;;  %v3016_v49 = vsub.f32 %v46_v44, %v783_v47  ;;  %v48_v51 = vld [vmem:[%s3296_s4 + $0x28] sm:$0xff]  ;;  %v3026_v55 = vpack.c.bf16 %v777_v40, %v774_v39 }
 0x124   :  { %v263_v59 = vpop.f32.mrb[4].mxu0  ;;  %2208 = vmatmul.mubr.msk.bf16.vlgmr.msra.gmra.mrb[0].mxu1 %vm329_vm1, %v2950_v54  ;;  %v3028_v56 = vsub.f32 %v47_v50, %v786_v53  ;;  %v878_v40 = vsub.f32 %v3002_v41, %v877_v37 }
 0x125   :  { %v319_v60 = vpack.c.bf16 %v310_v58, %v309_v57  ;;  %v2185_v61 = vpop.f32.mrb[5].mxu0  ;;  %2213 = vmatprep.mubr.msk.bf16.mxu1 %vm2821_vm0, %v2820_v1  ;;  %v2579_v52 = vpack.c.bf16 %v3016_v49, %v3014_v48  ;;  %v49_v58 = vld [vmem:[%s3296_s4 + $0x30] sm:$0xff] }
 0x126   :  { %v266_v62 = vpop.f32.mrb[6].mxu0  ;;  %v792_v61 = vand.u32 4294901760, %v49_v58  ;;  %v879_v44 = vand.u32 4294901760, %v878_v40 }
 0x127   :  { %v295_v63 = vpack.c.bf16 %v266_v62, %v263_v59  ;;  %v2186_v0 = vpop.f32.mrb[7].mxu0  ;;  %2200 = vmatpush3.bf16.msra.mxu0 %v319_v60 }
 0x128   :  { %2512 = vmatprep.subr.bf16.mxu0 %v3026_v55 }
 0x129   :  { %v301_v2 = vunpack.c.l.bf16 %v295_v63  ;;  %v302_v3 = vunpack.c.h.bf16 %v295_v63 }
 0x12a   :  { %2202 = vmatmul.mubr.msk.bf16.vlgmr.msra.gmra.mrb[20].mxu0 %vm329_vm1, %v2950_v54 }
 0x12b   :  { %v311_v4 = vsub.f32 %v263_v59, %v301_v2  ;;  %v312_v5 = vsub.f32 %v266_v62, %v302_v3  ;;  %v50_v59 = vld [vmem:[%s3296_s4 + $0x38] sm:$0xff]  ;;  %2514 = vmatpush3.bf16.msra.mxu0 %v3026_v55  ;;  %v3046_v2 = vsub.f32 %v49_v58, %v792_v61  ;;  %v51_v3 = vld [vmem:[%s3296_s4 + $0x40] sm:$0xff] }
 0x12c   :  { %v271_v6 = vpop.f32.mrb[8].mxu0  ;;  %v795_v62 = vand.u32 4294901760, %v50_v59 }
 0x12d   :  { %v320_v7 = vpack.c.bf16 %v312_v5, %v311_v4  ;;  %v2189_v8 = vpop.f32.mrb[9].mxu0  ;;  %v52_v4 = vld [vmem:[%s3296_s4 + $0x48] sm:$0xff] }
 0x12e   :  { %v274_v9 = vpop.f32.mrb[10].mxu0  ;;  %v3054_v5 = vsub.f32 %v50_v59, %v795_v62 }
 0x12f   :  { %v296_v10 = vpack.c.bf16 %v274_v9, %v271_v6  ;;  %v2190_v11 = vpop.f32.mrb[11].mxu0  ;;  %2212 = vmatpush3.bf16.msra.mxu1 %v320_v7  ;;  %v801_v7 = vand.u32 4294901760, %v52_v4 }
 0x130   :  { %2217 = vmatprep.subr.bf16.mxu1 %v2820_v1  ;;  %v2587_v8 = vpack.c.bf16 %v3054_v5, %v3046_v2  ;;  %v3064_v11 = vpack.c.bf16 %v795_v62, %v792_v61 }
 0x131   :  { %v303_v12 = vunpack.c.l.bf16 %v296_v10  ;;  %v304_v13 = vunpack.c.h.bf16 %v296_v10 }
 0x132   :  { %2214 = vmatmul.mubr.msk.bf16.vlgmr.msra.gmra.mrb[4].mxu1 %vm329_vm1, %v2950_v54 }
 0x133   :  { %v313_v14 = vsub.f32 %v271_v6, %v303_v12  ;;  %v314_v15 = vsub.f32 %v274_v9, %v304_v13  ;;  %2218 = vmatpush3.bf16.msra.mxu1 %v295_v63  ;;  %2219 = vmatprep.mubr.msk.bf16.mxu1 %vm2821_vm0, %v2820_v1  ;;  %v3042_v63 = vpack.c.bf16 %v783_v47, %v780_v46  ;;  %v798_v6 = vand.u32 4294901760, %v51_v3  ;;  %v53_v13 = vld [vmem:[%s3296_s4 + $0x50] sm:$0xff] }
 0x134   :  { %v279_v16 = vpop.f32.mrb[12].mxu0  ;;  %2223 = vmatprep.subr.bf16.mxu1 %v2820_v1  ;;  %v891_v46 = vand.u32 4294901760, %v3014_v48  ;;  %v898_v47 = vand.u32 4294901760, %v3016_v49 }
 0x135   :  { %v321_v17 = vpack.c.bf16 %v314_v15, %v313_v14  ;;  %v2193_v18 = vpop.f32.mrb[13].mxu0  ;;  %2516 = vmatprep.subr.bf16.mxu0 %v3042_v63  ;;  %v3060_v9 = vsub.f32 %v51_v3, %v798_v6  ;;  %v54_v14 = vld [vmem:[%s3296_s4 + $0x58] sm:$0xff]  ;;  %v804_v15 = vand.u32 4294901760, %v53_v13 }
 0x136   :  { %v282_v19 = vpop.f32.mrb[14].mxu0  ;;  %2518 = vmatpush3.bf16.msra.mxu0 %v3042_v63 }
 0x137   :  { %v297_v20 = vpack.c.bf16 %v282_v19, %v279_v16  ;;  %v2194_v21 = vpop.f32.mrb[15].mxu0  ;;  %v3079_v18 = vsub.f32 %v53_v13, %v804_v15 }
 0x138   :  { %v56_v21 = vld [vmem:[%s3296_s4 + $0x68] sm:$0xff] }
 0x139   :  { %v305_v22 = vunpack.c.l.bf16 %v297_v20  ;;  %v306_v23 = vunpack.c.h.bf16 %v297_v20 }
 0x13b   :  { %v315_v24 = vsub.f32 %v279_v16, %v305_v22  ;;  %v316_v25 = vsub.f32 %v282_v19, %v306_v23  ;;  %v807_v16 = vand.u32 4294901760, %v54_v14 }
 0x13c   :  { %v287_v26 = vpop.f32.mrb[16].mxu0 }
 0x13d   :  { %v322_v27 = vpack.c.bf16 %v316_v25, %v315_v24  ;;  %v2197_v28 = vpop.f32.mrb[17].mxu0  ;;  %v3081_v19 = vsub.f32 %v54_v14, %v807_v16  ;;  %v813_v24 = vand.u32 4294901760, %v56_v21 }
 0x13e   :  { %v290_v29 = vpop.f32.mrb[18].mxu0  ;;  %2220 = vmatmul.mubr.msk.bf16.vlgmr.msra.gmra.mrb[4].mxu1 %vm329_vm1, %v2950_v54  ;;  %v58_v28 = vld [vmem:[%s3296_s4 + $0x78] sm:$0xff] }
 0x13f   :  { %v298_v30 = vpack.c.bf16 %v290_v29, %v287_v26  ;;  %2224 = vmatpush3.bf16.msra.mxu1 %v321_v17  ;;  %v2198_v31 = vpop.f32.mrb[19].mxu0  ;;  %2225 = vmatprep.mubr.msk.bf16.mxu1 %vm2821_vm0, %v2820_v1  ;;  %v3076_v17 = vpack.c.bf16 %v801_v7, %v798_v6  ;;  %v2595_v22 = vpack.c.bf16 %v3081_v19, %v3079_v18 }
 0x140   :  { %2229 = vmatprep.subr.bf16.mxu1 %v2820_v1  ;;  %v819_v31 = vand.u32 4294901760, %v58_v28 }
 0x141   :  { %v307_v32 = vunpack.c.l.bf16 %v298_v30  ;;  %v308_v33 = vunpack.c.h.bf16 %v298_v30 }
 0x143   :  { %v317_v34 = vsub.f32 %v287_v26, %v307_v32  ;;  %v318_v35 = vsub.f32 %v290_v29, %v308_v33  ;;  %v3095_v26 = vsub.f32 %v56_v21, %v813_v24  ;;  %v3106_v32 = vpack.c.bf16 %v807_v16, %v804_v15 }
 0x145   :  { %v323_v36 = vpack.c.bf16 %v318_v35, %v317_v34  ;;  %v3110_v34 = vsub.f32 %v58_v28, %v819_v31 }
 0x146   :  { %2226 = vmatmul.mubr.msk.bf16.vlgmr.msra.gmra.mrb[8].mxu1 %vm329_vm1, %v2950_v54 }
 0x147   :  { %2230 = vmatpush3.bf16.msra.mxu1 %v296_v10  ;;  %2231 = vmatprep.mubr.msk.bf16.mxu1 %vm2821_vm0, %v2820_v1  ;;  %v3062_v10 = vsub.f32 %v52_v4, %v801_v7 }
 0x148   :  { %2235 = vmatprep.subr.bf16.mxu1 %v2820_v1 }
 0x149   :  { %v2591_v12 = vpack.c.bf16 %v3062_v10, %v3060_v9 }
 0x152   :  { %2232 = vmatmul.mubr.msk.bf16.vlgmr.msra.gmra.mrb[8].mxu1 %vm329_vm1, %v2950_v54 }
 0x153   :  { %2236 = vmatpush3.bf16.msra.mxu1 %v322_v27  ;;  %2237 = vmatprep.mubr.msk.bf16.mxu1 %vm2821_vm0, %v2820_v1  ;;  %v57_v27 = vld [vmem:[%s3296_s4 + $0x70] sm:$0xff] }
 0x154   :  { %2241 = vmatprep.subr.bf16.mxu1 %v2820_v1 }
 0x15a   :  { %2238 = vmatmul.mubr.msk.bf16.vlgmr.msra.gmra.mrb[12].mxu1 %vm329_vm1, %v2950_v54 }
 0x15b   :  { %2242 = vmatpush3.bf16.msra.mxu1 %v297_v20  ;;  %2243 = vmatprep.mubr.msk.bf16.mxu1 %vm2821_vm0, %v2820_v1  ;;  %v55_v20 = vld [vmem:[%s3296_s4 + $0x60] sm:$0xff] }
 0x15c   :  { %2247 = vmatprep.subr.bf16.mxu1 %v2820_v1  ;;  %v810_v23 = vand.u32 4294901760, %v55_v20 }
 0x15e   :  { %v3093_v25 = vsub.f32 %v55_v20, %v810_v23  ;;  %v947_v20 = vand.u32 4294901760, %v3079_v18 }
 0x160   :  { %v2599_v29 = vpack.c.bf16 %v3095_v26, %v3093_v25 }
 0x166   :  { %2244 = vmatmul.mubr.msk.bf16.vlgmr.msra.gmra.mrb[12].mxu1 %vm329_vm1, %v2950_v54 }
 0x167   :  { %2248 = vmatpush3.bf16.msra.mxu1 %v323_v36  ;;  %2249 = vmatprep.mubr.msk.bf16.mxu1 %vm2821_vm0, %v2820_v1  ;;  %v3116_v36 = vpack.c.bf16 %v813_v24, %v810_v23 }
 0x168   :  { %2253 = vmatprep.subr.bf16.mxu1 %v2820_v1 }
 0x16e   :  { %2250 = vmatmul.mubr.msk.bf16.vlgmr.msra.gmra.mrb[16].mxu1 %vm329_vm1, %v2950_v54 }
 0x16f   :  { %2254 = vmatpush3.bf16.msra.mxu1 %v298_v30  ;;  %2255 = vmatprep.mubr.msk.bf16.mxu1 %vm2821_vm0, %v2820_v1  ;;  %v816_v30 = vand.u32 4294901760, %v57_v27 }
 0x170   :  { %2576 = vmatprep.subr.bf16.mxu1 %v2575_v45 }
 0x171   :  { %v3108_v33 = vsub.f32 %v57_v27, %v816_v30  ;;  %v3123_v39 = vpack.c.bf16 %v819_v31, %v816_v30  ;;  %v961_v27 = vand.u32 4294901760, %v3093_v25 }
 0x173   :  { %v2603_v35 = vpack.c.bf16 %v3110_v34, %v3108_v33 }
 0x17a   :  { %2256 = vmatmul.mubr.msk.bf16.vlgmr.msra.gmra.mrb[16].mxu1 %vm329_vm1, %v2950_v54  ;;  %v789_v54 = vand.u32 4294901760, %v48_v51 }
 0x17b   :  { %2578 = vmatpush3.bf16.msra.mxu1 %v2575_v45  ;;  %v886_v45 = vand.u32 4294901760, %v885_v43 }
 0x17c   :  { %2580 = vmatprep.subr.bf16.mxu1 %v2579_v52  ;;  %v3030_v57 = vsub.f32 %v48_v51, %v789_v54  ;;  %v3044_v0 = vpack.c.bf16 %v789_v54, %v786_v53  ;;  %v892_v51 = vsub.f32 %v3014_v48, %v891_v46  ;;  %v905_v53 = vand.u32 4294901760, %v3028_v56 }
 0x17d   :  { %v3131_v50 = vpack.c.bf16 %v886_v45, %v879_v44  ;;  %v919_v48 = vand.u32 4294901760, %v3046_v2 }
 0x17e   :  { %v2583_v60 = vpack.c.bf16 %v3030_v57, %v3028_v56  ;;  %2520 = vmatprep.subr.bf16.mxu0 %v3044_v0  ;;  %v893_v41 = vand.u32 4294901760, %v892_v51  ;;  %v912_v54 = vand.u32 4294901760, %v3030_v57  ;;  %v906_v59 = vsub.f32 %v3028_v56, %v905_v53 }
 0x17f   :  { %2582 = vmatpush3.bf16.msra.mxu1 %v2579_v52  ;;  %2522 = vmatpush3.bf16.msra.mxu0 %v3044_v0  ;;  %v899_v52 = vsub.f32 %v3016_v49, %v898_v47  ;;  %v926_v49 = vand.u32 4294901760, %v3054_v5  ;;  %v920_v4 = vsub.f32 %v3046_v2, %v919_v48  ;;  %v940_v56 = vand.u32 4294901760, %v3062_v10 }
 0x180   :  { %2584 = vmatprep.subr.bf16.mxu1 %v2583_v60  ;;  %2524 = vmatprep.subr.bf16.mxu0 %v3064_v11  ;;  %v907_v61 = vand.u32 4294901760, %v906_v59  ;;  %v954_v2 = vand.u32 4294901760, %v3081_v19  ;;  %v3172_v51 = vpack.c.bf16 %v884_v38, %v877_v37  ;;  %v3176_v59 = vpack.c.bf16 %v898_v47, %v891_v46 }
 0x181   :  { %v900_v42 = vand.u32 4294901760, %v899_v52  ;;  %v927_v6 = vsub.f32 %v3054_v5, %v926_v49  ;;  %v921_v7 = vand.u32 4294901760, %v920_v4  ;;  %v941_v14 = vsub.f32 %v3062_v10, %v940_v56 }
 0x182   :  { %v948_v5 = vsub.f32 %v3079_v18, %v947_v20  ;;  %v962_v10 = vsub.f32 %v3093_v25, %v961_v27  ;;  %v982_v18 = vand.u32 4294901760, %v3110_v34  ;;  %v3184_v38 = vpack.c.bf16 %v954_v2, %v947_v20 }
 0x183   :  { %2586 = vmatpush3.bf16.msra.mxu1 %v2583_v60  ;;  %2526 = vmatpush3.bf16.msra.mxu0 %v3064_v11  ;;  %v3138_v58 = vpack.c.bf16 %v900_v42, %v893_v41  ;;  %v913_v60 = vsub.f32 %v3030_v57, %v912_v54  ;;  %v942_v16 = vand.u32 4294901760, %v941_v14 }
 0x184   :  { %2588 = vmatprep.subr.bf16.mxu1 %v2587_v8  ;;  %2528 = vmatprep.subr.bf16.mxu0 %v3076_v17  ;;  %v949_v23 = vand.u32 4294901760, %v948_v5  ;;  %v963_v30 = vand.u32 4294901760, %v962_v10  ;;  %v983_v43 = vsub.f32 %v3110_v34, %v982_v18  ;;  %v3180_v34 = vpack.c.bf16 %v926_v49, %v919_v48 }
 0x185   :  { %v914_v62 = vand.u32 4294901760, %v913_v60 }
 0x186   :  { %v984_v25 = vand.u32 4294901760, %v983_v43 }
 0x187   :  { %2590 = vmatpush3.bf16.msra.mxu1 %v2587_v8  ;;  %2530 = vmatpush3.bf16.msra.mxu0 %v3076_v17  ;;  %v3144_v3 = vpack.c.bf16 %v914_v62, %v907_v61  ;;  %v928_v8 = vand.u32 4294901760, %v927_v6 }
 0x188   :  { %2592 = vmatprep.subr.bf16.mxu1 %v2591_v12  ;;  %2532 = vmatprep.subr.bf16.mxu0 %v3106_v32 }
 0x189   :  { %v3150_v13 = vpack.c.bf16 %v928_v8, %v921_v7  ;;  %v3178_v7 = vpack.c.bf16 %v912_v54, %v905_v53 }
 0x18b   :  { %2594 = vmatpush3.bf16.msra.mxu1 %v2591_v12  ;;  %2534 = vmatpush3.bf16.msra.mxu0 %v3106_v32  ;;  %v933_v12 = vand.u32 4294901760, %v3060_v9 }
 0x18c   :  { %2596 = vmatprep.subr.bf16.mxu1 %v2595_v22  ;;  %2536 = vmatprep.subr.bf16.mxu0 %v3116_v36 }
 0x18d   :  { %v934_v57 = vsub.f32 %v3060_v9, %v933_v12  ;;  %v968_v9 = vand.u32 4294901760, %v3095_v26  ;;  %v3182_v37 = vpack.c.bf16 %v940_v56, %v933_v12 }
 0x18f   :  { %2598 = vmatpush3.bf16.msra.mxu1 %v2595_v22  ;;  %2538 = vmatpush3.bf16.msra.mxu0 %v3116_v36  ;;  %v935_v15 = vand.u32 4294901760, %v934_v57  ;;  %v955_v22 = vsub.f32 %v3081_v19, %v954_v2  ;;  %v3186_v8 = vpack.c.bf16 %v968_v9, %v961_v27 }
 0x190   :  { %2600 = vmatprep.subr.bf16.mxu1 %v2599_v29  ;;  %2540 = vmatprep.subr.bf16.mxu0 %v3123_v39 }
 0x191   :  { %v3156_v21 = vpack.c.bf16 %v942_v16, %v935_v15  ;;  %v956_v24 = vand.u32 4294901760, %v955_v22 }
 0x193   :  { %2602 = vmatpush3.bf16.msra.mxu1 %v2599_v29  ;;  %2542 = vmatpush3.bf16.msra.mxu0 %v3123_v39  ;;  %v3162_v28 = vpack.c.bf16 %v956_v24, %v949_v23  ;;  %v969_v29 = vsub.f32 %v3095_v26, %v968_v9 }
 0x194   :  { %2604 = vmatprep.subr.bf16.mxu1 %v2603_v35  ;;  %2544 = vmatprep.subr.bf16.mxu0 %v3131_v50 }
 0x195   :  { %v970_v31 = vand.u32 4294901760, %v969_v29 }
 0x197   :  { %2606 = vmatpush3.bf16.msra.mxu1 %v2603_v35  ;;  %v975_v35 = vand.u32 4294901760, %v3108_v33  ;;  %v3168_v40 = vpack.c.bf16 %v970_v31, %v963_v30 }
 0x198   :  { %2608 = vmatprep.subr.bf16.mxu1 %v3026_v55 }
 0x199   :  { %v976_v19 = vsub.f32 %v3108_v33, %v975_v35  ;;  %v3188_v15 = vpack.c.bf16 %v982_v18, %v975_v35 }
 0x19b   :  { %v977_v52 = vand.u32 4294901760, %v976_v19 }
 0x19d   :  { %v3174_v42 = vpack.c.bf16 %v984_v25, %v977_v52 }
 0x1f7   :  { %v408_v44 = vpop.f32.mrb[0].mxu1 }
 0x1f8   :  { %v2209_v45 = vpop.f32.mrb[1].mxu1 }
 0x1f9   :  { %v411_v41 = vpop.f32.mrb[2].mxu1 }
 0x1fa   :  { %v2210_v26 = vpop.f32.mrb[3].mxu1 }
 0x1fd   :  { %v367_v60 = vpop.f32.mrb[20].mxu0 }
 0x1fe   :  { %v409_v61 = vadd.f32 %v408_v44, %v367_v60  ;;  %v2203_v62 = vpop.f32.mrb[21].mxu0 }
 0x1ff   :  { %v370_v4 = vpop.f32.mrb[22].mxu0 }
 0x200   :  { %v412_v6 = vadd.f32 %v411_v41, %v370_v4  ;;  %v2204_v33 = vpop.f32.mrb[23].mxu0  ;;  %v751_v22 = vmul.f32 %v409_v61, %v409_v61 }
 0x202   :  { %v752_v23 = vmul.f32 %v412_v6, %v412_v6  ;;  %v753_v53 = vmul.f32 0.020408163, %v751_v22 }
 0x204   :  { %v754_v12 = vmul.f32 0.020408163, %v752_v23 }
 0x211   :  { %v490_v57 = vpop.f32.mrb[4].mxu1 }
 0x212   :  { %v743_v14 = vmul.f32 %v490_v57, %v409_v61  ;;  %v2221_v46 = vpop.f32.mrb[5].mxu1  ;;  %v759_v24 = vmul.f32 %v490_v57, %v490_v57 }
 0x213   :  { %v493_v47 = vpop.f32.mrb[6].mxu1 }
 0x214   :  { %v744_v16 = vmul.f32 %v493_v47, %v412_v6  ;;  %v2222_v5 = vpop.f32.mrb[7].mxu1  ;;  %v760_v27 = vmul.f32 %v493_v47, %v493_v47  ;;  %v761_v9 = vmul.f32 0.020408163, %v759_v24  ;;  %v745_v26 = vmul.f32 0.020408163, %v743_v14 }
 0x216   :  { %v762_v29 = vmul.f32 0.020408163, %v760_v27  ;;  %v746_v61 = vmul.f32 0.020408163, %v744_v16 }
 0x225   :  { %v572_v54 = vpop.f32.mrb[8].mxu1 }
 0x226   :  { %v755_v48 = vsub.f32 %v572_v54, %v753_v53  ;;  %v2233_v49 = vpop.f32.mrb[9].mxu1 }
 0x227   :  { %v575_v56 = vpop.f32.mrb[10].mxu1 }
 0x228   :  { %v756_v20 = vsub.f32 %v575_v56, %v754_v12  ;;  %v2234_v2 = vpop.f32.mrb[11].mxu1  ;;  %v757_v18 = vmax.f32 %v755_v48, 0.0001 }
 0x22a   :  { %v758_v45 = vmax.f32 %v756_v20, 0.0001 }
 0x239   :  { %v654_v10 = vpop.f32.mrb[12].mxu1 }
 0x23a   :  { %v763_v30 = vsub.f32 %v654_v10, %v761_v9  ;;  %v2245_v31 = vpop.f32.mrb[13].mxu1 }
 0x23b   :  { %v657_v35 = vpop.f32.mrb[14].mxu1 }
 0x23c   :  { %v765_v19 = vmax.f32 %v763_v30, 0.0001  ;;  %v764_v43 = vsub.f32 %v657_v35, %v762_v29  ;;  %v2246_v44 = vpop.f32.mrb[15].mxu1 }
 0x23e   :  { %v767_v52 = vmul.f32 %v765_v19, %v757_v18  ;;  %v766_v25 = vmax.f32 %v764_v43, 0.0001 }
 0x240   :  { %v768_v41 = vmul.f32 %v766_v25, %v758_v45  ;;  %2792 = vrsqrt.f32 %v767_v52 }
 0x242   :  { %2794 = vrsqrt.f32 %v768_v41 }
 0x24a   :  { %v2793_v47 = vpop.eup %2792 }
 0x24c   :  { %v2795_v23 = vpop.eup %2794 }
 0x24d   :  { %v736_v60 = vpop.f32.mrb[16].mxu1 }
 0x24e   :  { %v747_v62 = vsub.f32 %v736_v60, %v745_v26  ;;  %v2257_v4 = vpop.f32.mrb[17].mxu1 }
 0x24f   :  { %v739_v6 = vpop.f32.mrb[18].mxu1 }
 0x250   :  { %v749_v33 = vmax.f32 %v747_v62, 0.0001  ;;  %v748_v57 = vsub.f32 %v739_v6, %v746_v61  ;;  %v2258_v46 = vpop.f32.mrb[19].mxu1 }
 0x252   :  { %v771_v5 = vmul.f32 %v2793_v47, %v749_v33  ;;  %v750_v22 = vmax.f32 %v748_v57, 0.0001 }
 0x254   :  { %v3190_v53 = vand.u32 4294901760, %v771_v5  ;;  %v772_v54 = vmul.f32 %v2795_v23, %v750_v22 }
 0x256   :  { %v3192_v48 = vand.u32 4294901760, %v772_v54  ;;  %v855_v49 = vsub.f32 %v771_v5, %v3190_v53 }
 0x258   :  { %v865_v14 = vsub.f32 %v772_v54, %v3192_v48  ;;  %2361 = vmatprep.mubr.f32.mxu1 %v855_v49  ;;  %v856_v16 = vand.u32 4294901760, %v855_v49 }
 0x25a   :  { %v866_v12 = vand.u32 4294901760, %v865_v14  ;;  %2362 = vmatmul.mubr.f32.vlgmr.msra.gmra.mrb[20].mxu1 %v865_v14  ;;  %v857_v56 = vsub.f32 %v855_v49, %v856_v16 }
 0x25b   :  { %2610 = vmatpush3.bf16.msra.mxu1 %v3026_v55  ;;  %2396 = vmatprep.mubr.f32.mxu1 %v856_v16 }
 0x25c   :  { %2612 = vmatprep.subr.bf16.mxu1 %v3042_v63  ;;  %v858_v20 = vand.u32 4294901760, %v857_v56  ;;  %v867_v2 = vsub.f32 %v865_v14, %v866_v12 }
 0x25e   :  { %2291 = vmatprep.mubr.f32.mxu0 %v858_v20  ;;  %v868_v24 = vand.u32 4294901760, %v867_v2 }
 0x25f   :  { %2614 = vmatpush3.bf16.msra.mxu1 %v3042_v63 }
 0x260   :  { %2292 = vmatmul.mubr.f32.vlgmr.msra.gmra.mrb[24].mxu0 %v868_v24  ;;  %2616 = vmatprep.subr.bf16.mxu1 %v3044_v0 }
 0x261   :  { %2546 = vmatpush3.bf16.msra.mxu0 %v3131_v50  ;;  %2326 = vmatprep.mubr.f32.mxu0 %v3190_v53 }
 0x262   :  { %2548 = vmatprep.subr.bf16.mxu0 %v3138_v58 }
 0x263   :  { %2618 = vmatpush3.bf16.msra.mxu1 %v3044_v0 }
 0x264   :  { %2620 = vmatprep.subr.bf16.mxu1 %v3064_v11 }
 0x265   :  { %2550 = vmatpush3.bf16.msra.mxu0 %v3138_v58 }
 0x266   :  { %2552 = vmatprep.subr.bf16.mxu0 %v3144_v3 }
 0x267   :  { %2622 = vmatpush3.bf16.msra.mxu1 %v3064_v11 }
 0x268   :  { %2624 = vmatprep.subr.bf16.mxu1 %v3076_v17 }
 0x269   :  { %2554 = vmatpush3.bf16.msra.mxu0 %v3144_v3 }
 0x26a   :  { %2556 = vmatprep.subr.bf16.mxu0 %v3150_v13 }
 0x26b   :  { %2626 = vmatpush3.bf16.msra.mxu1 %v3076_v17 }
 0x26c   :  { %2628 = vmatprep.subr.bf16.mxu1 %v3106_v32 }
 0x26d   :  { %2558 = vmatpush3.bf16.msra.mxu0 %v3150_v13 }
 0x26e   :  { %2560 = vmatprep.subr.bf16.mxu0 %v3156_v21 }
 0x26f   :  { %2630 = vmatpush3.bf16.msra.mxu1 %v3106_v32 }
 0x270   :  { %2632 = vmatprep.subr.bf16.mxu1 %v3116_v36 }
 0x271   :  { %2562 = vmatpush3.bf16.msra.mxu0 %v3156_v21 }
 0x272   :  { %2564 = vmatprep.subr.bf16.mxu0 %v3162_v28 }
 0x273   :  { %2634 = vmatpush3.bf16.msra.mxu1 %v3116_v36 }
 0x274   :  { %2636 = vmatprep.subr.bf16.mxu1 %v3123_v39 }
 0x275   :  { %2566 = vmatpush3.bf16.msra.mxu0 %v3162_v28 }
 0x276   :  { %2568 = vmatprep.subr.bf16.mxu0 %v3168_v40 }
 0x277   :  { %2638 = vmatpush3.bf16.msra.mxu1 %v3123_v39 }
 0x278   :  { %2640 = vmatprep.subr.bf16.mxu1 %v3172_v51 }
 0x279   :  { %2570 = vmatpush3.bf16.msra.mxu0 %v3168_v40 }
 0x27a   :  { %2397 = vmatmul.mubr.f32.vlgmr.msra.gmra.mrb[20].mxu1 %v866_v12  ;;  %2572 = vmatprep.subr.bf16.mxu0 %v3174_v42 }
 0x27b   :  { %2642 = vmatpush3.bf16.msra.mxu1 %v3172_v51  ;;  %2431 = vmatprep.mubr.f32.mxu1 %v3190_v53 }
 0x27c   :  { %2644 = vmatprep.subr.bf16.mxu1 %v3176_v59 }
 0x27d   :  { %2574 = vmatpush3.bf16.msra.mxu0 %v3174_v42 }
 0x27f   :  { %2646 = vmatpush3.bf16.msra.mxu1 %v3176_v59 }
 0x280   :  { %2327 = vmatmul.mubr.f32.vlgmr.msra.gmra.mrb[24].mxu0 %v3192_v48  ;;  %2648 = vmatprep.subr.bf16.mxu1 %v3178_v7 }
 0x281   :  { %2473 = vmatprep.mubr.msk.f32.mxu0 %vm2821_vm0, %v2820_v1 }
 0x283   :  { %2650 = vmatpush3.bf16.msra.mxu1 %v3178_v7 }
 0x284   :  { %2652 = vmatprep.subr.bf16.mxu1 %v3180_v34 }
 0x287   :  { %2654 = vmatpush3.bf16.msra.mxu1 %v3180_v34 }
 0x288   :  { %2656 = vmatprep.subr.bf16.mxu1 %v3182_v37 }
 0x28b   :  { %2658 = vmatpush3.bf16.msra.mxu1 %v3182_v37 }
 0x28c   :  { %2660 = vmatprep.subr.bf16.mxu1 %v3184_v38 }
 0x28f   :  { %2662 = vmatpush3.bf16.msra.mxu1 %v3184_v38 }
 0x290   :  { %2664 = vmatprep.subr.bf16.mxu1 %v3186_v8 }
 0x293   :  { %2666 = vmatpush3.bf16.msra.mxu1 %v3186_v8 }
 0x294   :  { %2668 = vmatprep.subr.bf16.mxu1 %v3188_v15 }
 0x297   :  { %2670 = vmatpush3.bf16.msra.mxu1 %v3188_v15 }
 0x298   :  { %2672 = vmatprep.subr.bf16.mxu1 %v3026_v55 }
 0x29a   :  { %2432 = vmatmul.mubr.f32.vlgmr.msra.gmra.mrb[20].mxu1 %v3192_v48 }
 0x29b   :  { %2674 = vmatpush3.bf16.msra.mxu1 %v3026_v55  ;;  %2466 = vmatprep.mubr.f32.mxu1 %v3190_v53  ;;  %v2822_v55 = vmov 0.0|0.0  }
 0x29c   :  { %2676 = vmatprep.subr.bf16.mxu1 %v3042_v63  ;;  %2703 = vmatprep.subr.bf16.mxu0 %v2822_v55 }
 0x29f   :  { %2678 = vmatpush3.bf16.msra.mxu1 %v3042_v63 }
 0x2a0   :  { %2680 = vmatprep.subr.bf16.mxu1 %v3044_v0 }
 0x2a3   :  { %2682 = vmatpush3.bf16.msra.mxu1 %v3044_v0 }
 0x2a4   :  { %2684 = vmatprep.subr.bf16.mxu1 %v3064_v11 }
 0x2a7   :  { %2686 = vmatpush3.bf16.msra.mxu1 %v3064_v11  ;;  %v59_v11 = vld [vmem:[%s3297_s5] sm:$0x1]  ;;  %s2823_s5 = smov [#allocation2]  }
 0x2a8   :  { %2688 = vmatprep.subr.bf16.mxu1 %v3076_v17  ;;  %s1928_s24 = sshll.u32 %s2823_s5, 4  ;;  %s1929_s24 = int_to_ptr.vmem [resolvable:$true] %s1928_s24 }
 0x2a9   :  { %s2796_s25 = scalar_lea.vmem %s1929_s24, 16  ;;  %s2800_s26 = scalar_lea.vmem %s1929_s24, 32 }
 0x2aa   :  { %p2797_p0 = scmp.ne.s32.totalorder %s1929_s24, %s2796_s25  ;;  %p2801_p1 = scmp.lt.s32.totalorder %s1929_s24, %s1929_s24 }
 0x2ab   :  { %2690 = vmatpush3.bf16.msra.mxu1 %v3076_v17  ;;  %v1458_v17 = vsel %vm329_vm1, %v59_v11, 0  ;;  %p2802_p2 = scmp.lt.s32.totalorder %s2800_s26, %s2796_s25 }
 0x2ac   :  { %2692 = vmatprep.subr.bf16.mxu1 %v3106_v32 }
 0x2ad   :  { %p2803_p3 = por %p2802_p2, %p2801_p1 }
 0x2af   :  { %2694 = vmatpush3.bf16.msra.mxu1 %v3106_v32  ;;  %v1527_v32 = vand.u32 4294901760, %v1458_v17  ;;  %p2804_p4 = pnand %p2803_p3, %p2797_p0 }
 0x2b0   :  { %2696 = vmatprep.subr.bf16.mxu1 %v3116_v36 }
 0x2b1   :  { %v1528_v50 = vsub.f32 %v1458_v17, %v1527_v32 }
 0x2b3   :  { %2698 = vmatpush3.bf16.msra.mxu1 %v3116_v36  ;;  %v1529_v58 = vand.u32 4294901760, %v1528_v50 }
 0x2b4   :  { %2700 = vmatprep.subr.bf16.mxu1 %v3123_v39 }
 0x2b5   :  { %v1530_v28 = vsub.f32 %v1528_v50, %v1529_v58 }
 0x2b7   :  { %2702 = vmatpush3.bf16.msra.mxu1 %v3123_v39  ;;  %v1531_v34 = vand.u32 4294901760, %v1530_v28 }
 0x2ba   :  { %2467 = vmatmul.mubr.f32.vlgmr.msra.gmra.mrb[20].mxu1 %v3192_v48 }
 0x353   :  { %v2328_v63 = vpop.f32.mrb[24].mxu0 }
 0x354   :  { %v1021_v0 = vpop.f32.mrb[25].mxu0 }
 0x38d   :  { %v2468_v36 = vpop.f32.mrb[20].mxu1 }
 0x38e   :  { %v2723_v3 = vadd.f32 %v2468_v36, %v2328_v63  ;;  %v1447_v13 = vpop.f32.mrb[21].mxu1 }
 0x38f   :  { %v2724_v21 = vadd.f32 %v1447_v13, %v1021_v0 }
 0x390   :  { %v1464_v39 = vand.u32 4294901760, %v2723_v3 }
 0x391   :  { %v1461_v40 = vand.u32 4294901760, %v2724_v21 }
 0x392   :  { %v1546_v51 = vsub.f32 %v2723_v3, %v1464_v39 }
 0x393   :  { %v2704_v42 = vpack.c.bf16 %v1464_v39, %v1461_v40  ;;  %v1539_v59 = vsub.f32 %v2724_v21, %v1461_v40 }
 0x394   :  { %v1547_v7 = vand.u32 4294901760, %v1546_v51 }
 0x395   :  { %v1540_v37 = vand.u32 4294901760, %v1539_v59  ;;  %v2710_v38 = vpack.c.bf16 %v1546_v51, %v1539_v59  ;;  %2705 = vmatpush3.bf16.msra.mxu0 %v2704_v42 }
 0x396   :  { %v1548_v8 = vsub.f32 %v1546_v51, %v1547_v7  ;;  %2706 = vmatprep.subr.bf16.mxu0 %v2822_v55 }
 0x397   :  { %v1541_v15 = vsub.f32 %v1539_v59, %v1540_v37  ;;  %v2716_v27 = vpack.c.bf16 %v1547_v7, %v1540_v37 }
 0x398   :  { %v1549_v9 = vand.u32 4294901760, %v1548_v8  ;;  %2474 = vmatmul.mubr.f32.vlgmr.msra.gmra.mrb[26].mxu0 %v1531_v34 }
 0x399   :  { %v1542_v10 = vand.u32 4294901760, %v1541_v15  ;;  %2480 = vmatprep.mubr.msk.f32.mxu0 %vm2821_vm0, %v2820_v1 }
 0x39b   :  { %v2707_v29 = vpack.c.bf16 %v1549_v9, %v1542_v10 }
 0x39d   :  { %2708 = vmatpush3.bf16.msra.mxu0 %v2707_v29 }
 0x39e   :  { %2709 = vmatprep.subr.bf16.mxu0 %v2822_v55 }
 0x3a0   :  { %2481 = vmatmul.mubr.f32.vlgmr.msra.gmra.mrb[26].mxu0 %v1527_v32 }
 0x3a1   :  { %2711 = vmatpush3.bf16.msra.mxu0 %v2710_v38  ;;  %2487 = vmatprep.mubr.msk.f32.mxu0 %vm2821_vm0, %v2820_v1 }
 0x3a2   :  { %2712 = vmatprep.subr.bf16.mxu0 %v2822_v55 }
 0x3a8   :  { %2488 = vmatmul.mubr.f32.vlgmr.msra.gmra.mrb[26].mxu0 %v1528_v50 }
 0x3a9   :  { %2714 = vmatpush3.bf16.msra.mxu0 %v2704_v42  ;;  %2494 = vmatprep.mubr.msk.f32.mxu0 %vm2821_vm0, %v2820_v1 }
 0x3aa   :  { %2715 = vmatprep.subr.bf16.mxu0 %v2822_v55 }
 0x3b0   :  { %2495 = vmatmul.mubr.f32.vlgmr.msra.gmra.mrb[26].mxu0 %v1529_v58 }
 0x3b1   :  { %2717 = vmatpush3.bf16.msra.mxu0 %v2716_v27  ;;  %2501 = vmatprep.mubr.msk.f32.mxu0 %vm2821_vm0, %v2820_v1 }
 0x3b2   :  { %2718 = vmatprep.subr.bf16.mxu0 %v2822_v55 }
 0x3b8   :  { %2502 = vmatmul.mubr.f32.vlgmr.msra.gmra.mrb[26].mxu0 %v1527_v32 }
 0x3b9   :  { %2720 = vmatpush3.bf16.msra.mxu0 %v2704_v42  ;;  %2508 = vmatprep.mubr.msk.f32.mxu0 %vm2821_vm0, %v2820_v1 }
 0x3c0   :  { %2509 = vmatmul.mubr.f32.vlgmr.msra.gmra.mrb[26].mxu0 %v1527_v32 }
 0x493   :  { %v1915_v30 = vpop.f32.mrb[26].mxu0 }
 0x494   :  { %v1919_v31 = vmul.f32 0.00390625, %v1915_v30  ;;  %v2510_v35 = vpop.f32.mrb[27].mxu0 }
 0x496   :  { %1921 = vst.msk [vmem:[#allocation2] sm:$0x1] %vm1920_vm2, %v1919_v31 }
 0x497   :  { %2807 = shalt.err (!%p2804_p4)
}
 0x498   :  { %s2808_s29 = scalar_lea.hbm %s3298_s6, 16 }
 0x499   :  { %p2809_p5 = scmp.ne.s32.totalorder %s3298_s6, %s2808_s29  ;;  %p2812_p6 = scmp.lt.u32.totalorder %s2808_s29, %s3298_s6 }
 0x49b   :  { %p2814_p7 = pnand %p2812_p6, %p2809_p5 }
 0x49d   :  { %2817 = shalt.err (!%p2814_p7)
}
 0x49e   :  { %1931 = dma.vmem_to_hbm [thread:$0]  %s1929_s24, 16, %s3298_s6, [#allocation3]  }
 0x49f   :  { %2818 = dma.done.wait [#allocation3], 16  }
 0x4a0   :  { %2819 = vsyncadd [#allocation3], 4294967280 }
 0x4a1   :  { %1935 = vsyncpa [#allocation3], 1 }

</bundles_post_ra>
